<compile_context>
chip_gen: v7x
topology: tpu7x:2x2x1
jax: 0.10.0
libtpu: 0.0.40
codegen_flags: <defaults>
</compile_context>

<pallas_src>
import functools

import jax
import jax.numpy as jnp
from jax.experimental import pallas as pl
from jax.experimental.pallas import tpu as pltpu

LANES = 128
SUBLANES = 8


def _loss_kernel(pred_ref, label_ref, acc_ref, *,
                 alpha_over_max, one_plus_eps, rows, block_rows,
                 blocks_per_slice, chunk_rows, needs_mask):
    c = pl.program_id(0)            # slice axis ("parallel", one per TensorCore)
    i = pl.program_id(1)            # block-within-slice axis ("arbitrary")
    gb = c * blocks_per_slice + i   # unclamped global block index

    # acc_ref is the resident output block for slice c: init once per slice.
    @pl.when(i == 0)
    def _():
        acc_ref[...] = jnp.zeros_like(acc_ref)

    def chunk_contrib(r0, nrows, masked):
        p = pred_ref[pl.ds(r0, nrows), :].astype(jnp.float32)
        l = label_ref[pl.ds(r0, nrows), :].astype(jnp.float32)
        # weights = log(1 + alpha*(label/max_value) + eps)
        #         = log(label*(alpha/max_value) + (1 + eps))   (constants folded)
        w = jnp.log(l * alpha_over_max + one_plus_eps)
        d = p - l
        contrib = w * d * d
        if masked:
            row_ids = (gb * block_rows + r0 +
                       jax.lax.broadcasted_iota(jnp.int32, contrib.shape, 0))
            contrib = jnp.where(row_ids < rows, contrib, 0.0)
        return contrib

    def block_sum(masked):
        if chunk_rows is not None:
            # Streamed path: keep temporaries at sub-chunk scale instead of
            # materializing block-sized weights/diff/contrib buffers.
            n_chunks = block_rows // chunk_rows

            def body(ci, carry):
                r0 = pl.multiple_of(ci * chunk_rows, chunk_rows)
                contrib = chunk_contrib(r0, chunk_rows, masked)
                return carry + contrib.reshape(
                    chunk_rows // SUBLANES, SUBLANES, LANES).sum(axis=0)

            return jax.lax.fori_loop(
                0, n_chunks, body,
                jnp.zeros((SUBLANES, LANES), jnp.float32), unroll=True)
        else:
            # Tiny single-tile fallback (block == whole array).
            contrib = chunk_contrib(0, block_rows, masked)
            pad = (-block_rows) % SUBLANES
            if pad:
                contrib = jnp.concatenate(
                    [contrib, jnp.zeros((pad, LANES), jnp.float32)], axis=0)
            return contrib.reshape(-1, SUBLANES, LANES).sum(axis=0)

    if needs_mask:
        full_blocks = rows // block_rows   # blocks that are entirely in range

        @pl.when(gb < full_blocks)
        def _():
            acc_ref[...] += block_sum(masked=False)

        @pl.when(gb >= full_blocks)
        def _():
            acc_ref[...] += block_sum(masked=True)
    else:
        acc_ref[...] += block_sum(masked=False)


def logarithmic_weighted_mse_loss(pred, label, *, alpha=0.01, epsilon=1e-6,
                                  max_value=150.0, block_rows=4096,
                                  chunk_rows=512):
    assert pred.shape == label.shape
    n = pred.size
    alpha_over_max = float(alpha) / float(max_value)
    one_plus_eps = 1.0 + float(epsilon)

    pred_flat = pred.reshape(-1)
    label_flat = label.reshape(-1)

    rows = n // LANES          # 128-aligned prefix rows
    prefix = rows * LANES

    total = jnp.zeros((), jnp.float32)

    if rows > 0:
        if prefix == n:
            pred2d = pred_flat.reshape(rows, LANES)        # free reshape
            label2d = label_flat.reshape(rows, LANES)
        else:
            # TODO(synk): avoid this prefix-slice copy by streaming the raw
            # flat arrays through a manual pl.ANY DMA with a flat-index mask.
            pred2d = pred_flat[:prefix].reshape(rows, LANES)
            label2d = label_flat[:prefix].reshape(rows, LANES)

        block_rows_eff = rows if rows <= block_rows else block_rows
        total_blocks = pl.cdiv(rows, block_rows_eff)
        num_slices = 2 if total_blocks >= 2 else 1
        bps = pl.cdiv(total_blocks, num_slices)
        # Mask only if some grid block extends past `rows` (partial last block
        # and/or a clamped duplicate block from an odd block count).
        needs_mask = (num_slices * bps * block_rows_eff) != rows
        chunk_eff = chunk_rows if (block_rows_eff % chunk_rows == 0) else None

        kernel = functools.partial(
            _loss_kernel,
            alpha_over_max=alpha_over_max,
            one_plus_eps=one_plus_eps,
            rows=int(rows),
            block_rows=int(block_rows_eff),
            blocks_per_slice=int(bps),
            chunk_rows=chunk_eff,
            needs_mask=bool(needs_mask),
        )

        def in_map(c, i):
            # Clamp so a duplicate trailing block (odd block count split over
            # 2 slices) stays in-bounds; its contribution is masked to zero.
            return (jnp.minimum(c * bps + i, total_blocks - 1), 0)

        partials = pl.pallas_call(
            kernel,
            out_shape=jax.ShapeDtypeStruct((num_slices * SUBLANES, LANES),
                                           jnp.float32),
            grid_spec=pltpu.PrefetchScalarGridSpec(
                num_scalar_prefetch=0,
                grid=(num_slices, bps),
                in_specs=[
                    pl.BlockSpec((block_rows_eff, LANES), in_map),
                    pl.BlockSpec((block_rows_eff, LANES), in_map),
                ],
                out_specs=pl.BlockSpec((SUBLANES, LANES), lambda c, i: (c, 0)),
            ),
            compiler_params=pltpu.CompilerParams(
                dimension_semantics=("parallel", "arbitrary")),
        )(pred2d, label2d)

        # Single cross-lane reduce of the tiny (num_slices*8, 128) partials.
        total = total + jnp.sum(partials)

    if prefix != n:
        # <= 127 leftover elements: compute their contribution outside the
        # kernel instead of padding/copying the full tensors.
        tp = pred_flat[prefix:].astype(jnp.float32)
        tl = label_flat[prefix:].astype(jnp.float32)
        tw = jnp.log(tl * alpha_over_max + one_plus_eps)
        total = total + jnp.sum(tw * (tp - tl) ** 2)

    return total / jnp.float32(n)


def _reference(pred, label, alpha=0.01, epsilon=1e-6, max_value=150.0):
    scaled_target = label / max_value
    weights = jnp.log(1.0 + alpha * scaled_target + epsilon)
    return jnp.mean(weights * (pred - label) ** 2)


if __name__ == "__main__":
    key = jax.random.PRNGKey(0)
    k1, k2 = jax.random.split(key)
    # NCHW, values in a plausible [0, max_value] range
    pred = jax.random.uniform(k1, (2, 4, 16, 16), jnp.float32) * 150.0
    label = jax.random.uniform(k2, (2, 4, 16, 16), jnp.float32) * 150.0

    loss = logarithmic_weighted_mse_loss(pred, label)
    loss = jax.block_until_ready(loss)

    ref = _reference(pred, label)
    assert jnp.allclose(loss, ref, rtol=1e-5, atol=1e-5), (loss, ref)
    print("KERNEL_OK")
</pallas_src>

<mosaic_0001>
module attributes {stable_mosaic.version = 11 : i64} {
  func.func @_loss_kernel(%arg0: i32, %arg1: i32, %arg2: memref<16x128xf32, #tpu.memory_space<vmem>>, %arg3: memref<16x128xf32, #tpu.memory_space<vmem>>, %arg4: memref<8x128xf32, #tpu.memory_space<vmem>>) attributes {dimension_semantics = [#tpu.dimension_semantics<parallel>, #tpu.dimension_semantics<arbitrary>], iteration_bounds = array<i64: 1, 1>, scalar_prefetch = 0 : i64, scratch_operands = 0 : i64, tpu.core_type = #tpu.core_type<tc>, window_params = [{transform_indices = @transform_0, window_bounds = array<i64: 16, 128>}, {transform_indices = @transform_1, window_bounds = array<i64: 16, 128>}, {transform_indices = @transform_2, window_bounds = array<i64: 8, 128>}]} {
    %c0_i32 = arith.constant 0 : i32
    %0 = arith.cmpi eq, %arg1, %c0_i32 : i32
    %1 = arith.extui %0 : i1 to i32
    %c0_i32_0 = arith.constant 0 : i32
    %2 = arith.cmpi ne, %1, %c0_i32_0 : i32
    scf.if %2 {
      %cst_10 = arith.constant 0.000000e+00 : f32
      %18 = vector.broadcast %cst_10 : f32 to vector<8x128xf32>
      %c0_11 = arith.constant 0 : index
      %c0_12 = arith.constant 0 : index
      %19 = vector.load %arg4[%c0_11, %c0_12] : memref<8x128xf32, #tpu.memory_space<vmem>>, vector<8x128xf32>
      tpu.vector_store %arg4[%c0_11, %c0_12], %18 {strides = array<i32>} : memref<8x128xf32, #tpu.memory_space<vmem>>, vector<8x128xf32>,
    } else {
    }
    %c0 = arith.constant 0 : index
    %c0_1 = arith.constant 0 : index
    %3 = vector.load %arg4[%c0, %c0_1] : memref<8x128xf32, #tpu.memory_space<vmem>>, vector<8x128xf32>
    %c0_2 = arith.constant 0 : index
    %c0_3 = arith.constant 0 : index
    %4 = vector.load %arg2[%c0_2, %c0_3] : memref<16x128xf32, #tpu.memory_space<vmem>>, vector<16x128xf32>
    %c0_4 = arith.constant 0 : index
    %c0_5 = arith.constant 0 : index
    %5 = vector.load %arg3[%c0_4, %c0_5] : memref<16x128xf32, #tpu.memory_space<vmem>>, vector<16x128xf32>
    %cst = arith.constant 6.66666674E-5 : f32
    %6 = vector.broadcast %cst : f32 to vector<16x128xf32>
    %7 = arith.mulf %5, %6 : vector<16x128xf32>
    %cst_6 = arith.constant 1.00000095 : f32
    %8 = vector.broadcast %cst_6 : f32 to vector<16x128xf32>
    %9 = arith.addf %7, %8 : vector<16x128xf32>
    %10 = math.log %9 : vector<16x128xf32>
    %11 = arith.subf %4, %5 : vector<16x128xf32>
    %12 = arith.mulf %10, %11 : vector<16x128xf32>
    %13 = arith.mulf %12, %11 : vector<16x128xf32>
    %14 = vector.shape_cast %13 : vector<16x128xf32> to vector<2x8x128xf32>
    %cst_7 = arith.constant dense<0.000000e+00> : vector<8x128xf32>
    %15 = vector.multi_reduction <add>, %14, %cst_7 [0] : vector<2x8x128xf32> to vector<8x128xf32>
    %16 = arith.addf %3, %15 : vector<8x128xf32>
    %c0_8 = arith.constant 0 : index
    %c0_9 = arith.constant 0 : index
    %17 = vector.load %arg4[%c0_8, %c0_9] : memref<8x128xf32, #tpu.memory_space<vmem>>, vector<8x128xf32>
    tpu.vector_store %arg4[%c0_8, %c0_9], %16 {strides = array<i32>} : memref<8x128xf32, #tpu.memory_space<vmem>>, vector<8x128xf32>,
    return
  }
  func.func @transform_0(%arg0: i32, %arg1: i32) -> (i32, i32) {
    %c1_i32 = arith.constant 1 : i32
    %0 = arith.muli %arg0, %c1_i32 : i32
    %1 = arith.addi %0, %arg1 : i32
    %c0_i32 = arith.constant 0 : i32
    %2 = arith.minsi %1, %c0_i32 : i32
    %c0_i32_0 = arith.constant 0 : i32
    %c0_i32_1 = arith.constant 0 : i32
    return %2, %c0_i32_0 : i32, i32
  }
  func.func @transform_1(%arg0: i32, %arg1: i32) -> (i32, i32) {
    %c1_i32 = arith.constant 1 : i32
    %0 = arith.muli %arg0, %c1_i32 : i32
    %1 = arith.addi %0, %arg1 : i32
    %c0_i32 = arith.constant 0 : i32
    %2 = arith.minsi %1, %c0_i32 : i32
    %c0_i32_0 = arith.constant 0 : i32
    %c0_i32_1 = arith.constant 0 : i32
    return %2, %c0_i32_0 : i32, i32
  }
  func.func @transform_2(%arg0: i32, %arg1: i32) -> (i32, i32) {
    %c0_i32 = arith.constant 0 : i32
    %c0_i32_0 = arith.constant 0 : i32
    return %arg0, %c0_i32 : i32, i32
  }
}

</mosaic_0001>

<bundles_post_ra>
// kernel: tpu_custom_call.1
= control target key start
LH: loop header
LB: loop body
LE: loop exit
PB: predicated region body
PF: predicated region fallthrough
CT: control target
= control target key end

     0   :  { %7 = vsyncpa [#allocation3], 0  ;;  %s245_s0 = inlined_call_operand.hbm [shape: f32[16,128], index: 0, kind: input, shape index: {}]   ;;  %s246_s1 = inlined_call_operand.hbm [shape: f32[16,128], index: 1, kind: input, shape index: {}]   ;;  %s247_s2 = inlined_call_operand.hbm [shape: f32[8,128], index: 2, kind: output, shape index: {}]  }
   0x1   :  { %8 = vsyncpa [#allocation6], 0 }
   0x2   :  { %9 = vsyncpa [#allocation4], 0  ;;  %s189_s9 = smov [#allocation2]   ;;  %s117_s13 = scalar_lea.hbm %s245_s0, 256 }
   0x3   :  { %s21_s10 = sshll.u32 %s189_s9, 4  ;;  %p118_p0 = scmp.ne.s32.totalorder %s245_s0, %s117_s13  ;;  %s22_s10 = int_to_ptr.vmem [resolvable:$true] %s21_s10 }
   0x4   :  { %p121_p1 = scmp.lt.u32.totalorder %s117_s13, %s245_s0 }
   0x6   :  { %p123_p2 = pnand %p121_p1, %p118_p0 }
   0x8   :  { %126 = shalt.err (!%p123_p2)
}
   0x9   :  { %s127_s18 = scalar_lea.vmem %s22_s10, 256  ;;  %p132_p4 = scmp.lt.s32.totalorder %s22_s10, %s22_s10 }
   0xa   :  { %p128_p3 = scmp.ne.s32.totalorder %s22_s10, %s127_s18  ;;  %p133_p5 = scmp.lt.s32.totalorder %s127_s18, %s127_s18 }
   0xc   :  { %p134_p6 = por %p133_p5, %p132_p4 }
   0xe   :  { %p135_p7 = pnand %p134_p6, %p128_p3 }
  0x10   :  { %138 = shalt.err (!%p135_p7)
}
  0x11   :  { %s190_s19 = smov 128   ;;  %s191_s20 = smov 8  }
  0x12   :  { %27 = dma.hbm_to_vmem [thread:$0]  %s245_s0, 256, %s22_s10, [#allocation3], %s190_s19, %s190_s19, %s191_s20  }
  0x13   :  { %s192_s23 = smov [#allocation5]   ;;  %s139_s27 = scalar_lea.hbm %s246_s1, 256 }
  0x14   :  { %s39_s24 = sshll.u32 %s192_s23, 4  ;;  %p140_p8 = scmp.ne.s32.totalorder %s246_s1, %s139_s27  ;;  %s40_s24 = int_to_ptr.vmem [resolvable:$true] %s39_s24 }
  0x15   :  { %p143_p9 = scmp.lt.u32.totalorder %s139_s27, %s246_s1 }
  0x17   :  { %p145_p10 = pnand %p143_p9, %p140_p8 }
  0x19   :  { %148 = shalt.err (!%p145_p10)
}
  0x1a   :  { %s149_s4 = scalar_lea.vmem %s40_s24, 256  ;;  %p154_p12 = scmp.lt.s32.totalorder %s40_s24, %s40_s24 }
  0x1b   :  { %p150_p11 = scmp.ne.s32.totalorder %s40_s24, %s149_s4  ;;  %p155_p13 = scmp.lt.s32.totalorder %s149_s4, %s149_s4 }
  0x1d   :  { %p156_p0 = por %p155_p13, %p154_p12 }
  0x1f   :  { %p157_p1 = pnand %p156_p0, %p150_p11 }
  0x21   :  { %160 = shalt.err (!%p157_p1)
}
  0x22   :  { %45 = dma.hbm_to_vmem [thread:$0]  %s246_s1, 256, %s40_s24, [#allocation6], %s190_s19, %s190_s19, %s191_s20  }
  0x23   :  { %183 = dma.done.wait [#allocation3], 256  }
  0x24   :  { %184 = vsyncadd [#allocation3], 4294967040 }
  0x25   :  { %185 = dma.done.wait [#allocation6], 256  }
  0x26   :  { %186 = vsyncadd [#allocation6], 4294967040  ;;  %v68_v0 = vld [vmem:[#allocation5] sm:$0xff]  ;;  %v69_v1 = vld [vmem:[#allocation5 + $0x8] sm:$0xff]  ;;  %s193_s1 = smov [#allocation7]  }
  0x27   :  { %v70_v2 = vmul.f32 6.666667e-05, %v68_v0  ;;  %v71_v3 = vmul.f32 6.666667e-05, %v69_v1  ;;  %v66_v6 = vld [vmem:[#allocation2] sm:$0xff]  ;;  %v67_v7 = vld [vmem:[#allocation2 + $0x8] sm:$0xff] }
  0x28   :  { %v78_v8 = vsub.f32 %v66_v6, %v68_v0  ;;  %v79_v10 = vsub.f32 %v67_v7, %v69_v1  ;;  %s93_s6 = sshll.u32 %s193_s1, 4  ;;  %s94_s6 = int_to_ptr.vmem [resolvable:$true] %s93_s6 }
  0x29   :  { %v72_v4 = vadd.f32 1.000001, %v70_v2  ;;  %v73_v5 = vadd.f32 1.000001, %v71_v3  ;;  %s161_s7 = scalar_lea.vmem %s94_s6, 128  ;;  %p166_p3 = scmp.lt.s32.totalorder %s94_s6, %s94_s6 }
  0x2a   :  { %p162_p2 = scmp.ne.s32.totalorder %s94_s6, %s161_s7  ;;  %p167_p4 = scmp.lt.s32.totalorder %s161_s7, %s161_s7 }
  0x2b   :  { %113 = vlog2.f32 %v72_v4 }
  0x2c   :  { %115 = vlog2.f32 %v73_v5  ;;  %p168_p5 = por %p167_p4, %p166_p3 }
  0x2e   :  { %p169_p6 = pnand %p168_p5, %p162_p2 }
  0x35   :  { %v114_v9 = vpop.eup %113 }
  0x36   :  { %v116_v11 = vpop.eup %115  ;;  %v75_v12 = vmul.f32 0.6931472, %v114_v9 }
  0x37   :  { %v77_v13 = vmul.f32 0.6931472, %v116_v11 }
  0x38   :  { %v80_v14 = vmul.f32 %v78_v8, %v75_v12 }
  0x39   :  { %v81_v15 = vmul.f32 %v79_v10, %v77_v13 }
  0x3a   :  { %v82_v16 = vmul.f32 %v80_v14, %v78_v8 }
  0x3b   :  { %v83_v17 = vmul.f32 %v81_v15, %v79_v10 }
  0x3d   :  { %v84_v18 = vadd.f32 %v83_v17, %v82_v16 }
  0x3f   :  { %86 = vst [vmem:[#allocation7] sm:$0xff] %v84_v18 }
  0x40   :  { %172 = shalt.err (!%p169_p6)
}
  0x41   :  { %s173_s10 = scalar_lea.hbm %s247_s2, 128 }
  0x42   :  { %p174_p7 = scmp.ne.s32.totalorder %s247_s2, %s173_s10  ;;  %p177_p8 = scmp.lt.u32.totalorder %s173_s10, %s247_s2 }
  0x44   :  { %p179_p9 = pnand %p177_p8, %p174_p7 }
  0x46   :  { %182 = shalt.err (!%p179_p9)
}
  0x47   :  { %96 = dma.vmem_to_hbm [thread:$0]  %s94_s6, 128, %s247_s2, [#allocation4]  }
  0x48   :  { %187 = dma.done.wait [#allocation4], 128  }
  0x49   :  { %188 = vsyncadd [#allocation4], 4294967168 }
  0x4a   :  { %100 = vsyncpa [#allocation3], 1 }
  0x4b   :  { %101 = vsyncpa [#allocation6], 1 }
  0x4c   :  { %102 = vsyncpa [#allocation4], 1 }

</bundles_post_ra>
